<compile_context>
chip_gen: v7x
topology: tpu7x:2x2x1
jax: 0.10.0
libtpu: 0.0.40
codegen_flags: <defaults>
</compile_context>

<pallas_src>
import functools
import math

import jax
import jax.numpy as jnp
from jax.experimental import pallas as pl
from jax.experimental.pallas import tpu as pltpu

K1, K2, K3 = 2, 3, 3                       # conv kernel widths
_RF = (K1 - 1) + (K2 - 1) + (K3 - 1)       # time shrinkage = 5
_NORM_EPS = 1e-12
_LANE_BUDGET = 8192                        # lanes per block (raiseable on v5e/v6e)
_VMEM_BUDGET = 40 << 20                    # keep the block working set v7x-safe


def _gelu(x, approximate):
    if approximate:
        # tanh approximation -> runs on the EUP (spare slot in this kernel)
        c = math.sqrt(2.0 / math.pi)
        return 0.5 * x * (1.0 + jnp.tanh(c * (x + 0.044715 * x * x * x)))
    # exact (erf) GELU, matching torch.nn.GELU() default
    return 0.5 * x * (1.0 + jax.lax.erf(x * 0.7071067811865476))


def _conv_taps(x, w_ref, b_ref, K, mxu_dtype):
    """Channels-first 'valid' conv over the flattened lane axis, full width.

    x     : (C, L) float32 activations, per-sample stride T along lanes.
    w_ref : (K, Cout, C) VMEM ref, tap-major weights in `mxu_dtype`.
    b_ref : (Cout, 1) VMEM ref, float32 bias column.
    out   : (Cout, L) float32.  Columns whose receptive field crosses a sample
            (or block-wraparound) boundary are garbage and are discarded by
            the wrapper.
    """
    C, L = x.shape
    acc = None
    for k in range(K):
        # tap_k[:, j] = x[:, (j + k) % L] -- lane-aligned XLU rotate instead of
        # a lane-misaligned slice (which would force a relayout copy).
        tap = x if k == 0 else pltpu.roll(x, shift=L - k, axis=1)
        y = jnp.dot(w_ref[k], tap.astype(mxu_dtype),
                    preferred_element_type=jnp.float32)
        acc = y if acc is None else acc + y
    return acc + b_ref[...]                 # single broadcast bias add


def _cebra_kernel(x_ref, w1_ref, b1_ref, w2_ref, b2_ref, w3_ref, b3_ref, o_ref,
                  *, normalize, mxu_dtype, approx_gelu):
    x = x_ref[...].astype(jnp.float32)                            # (Cin_pad, Lb)
    h = _gelu(_conv_taps(x, w1_ref, b1_ref, K1, mxu_dtype), approx_gelu)
    h = _gelu(_conv_taps(h, w2_ref, b2_ref, K2, mxu_dtype), approx_gelu)
    y = _conv_taps(h, w3_ref, b3_ref, K3, mxu_dtype)              # (Cout, Lb)
    if normalize:
        # _Norm: L2-normalize over the channel axis; rsqrt runs on the EUP.
        ssq = jnp.sum(y * y, axis=0, keepdims=True)
        y = y * jax.lax.rsqrt(ssq + _NORM_EPS)
    # Full-width, lane-dense, unmasked store (tail garbage discarded outside).
    o_ref[...] = y.astype(o_ref.dtype)


def _vmem_block_estimate(Lb, Cin_pad, H, Cout, in_bytes, out_bytes):
    """Rough per-block VMEM working set (bytes): resident f32 activations,
    in-flight rolled taps / bf16 operand copies, double-buffered I/O blocks,
    and the (tiny) resident weights."""
    act = 4 * (Cin_pad + 2 * H + Cout)                 # f32 activations
    taps = (4 + 2) * 2 * max(Cin_pad, H)               # rolled taps + cast copies
    io = 2 * (Cin_pad * in_bytes + Cout * out_bytes)   # double-buffered DMA
    w = 8 * (K1 * H * Cin_pad + K2 * H * H + K3 * Cout * H + 2 * H + Cout)
    return Lb * (act + taps + io) + w + (1 << 20)


def _pick_batch_tile(N, T, lane_budget):
    """Samples per grid step.  Targets (a) >= 2 grid steps whenever the batch
    can be split on a 128-lane boundary (so v7x's two TensorCores both get
    work via the 'parallel' grid axis) and (b) <= lane_budget lanes/block."""
    g = 128 // math.gcd(128, T)          # smallest nb with (nb*T) % 128 == 0
    if N <= g:
        return N                          # cannot split on an aligned boundary
    nb = min(max(1, lane_budget // T), -(-N // 2))
    nb = max(g, (nb // g) * g)
    return min(nb, N)


def cebra_forward(x_nct, params, *, normalize=True,
                  input_dtype=jnp.bfloat16, mxu_dtype=jnp.bfloat16,
                  output_dtype=jnp.float32, batch_tile=None,
                  lane_budget=_LANE_BUDGET, approximate_gelu=False):
    """CEBRA Model.forward: (num_samples, num_input, time) ->
    (num_samples, num_output, time - 5); squeezed to 2-D when time - 5 == 1.

    Defaults quantize the HBM input stream and the MXU operands to bfloat16
    (accumulation stays f32); pass input_dtype=mxu_dtype=jnp.float32 for a
    full-precision forward pass."""
    w1, b1, w2, b2, w3, b3 = params
    N, Cin, T = x_nct.shape
    H = w1.shape[2]
    Cout = w3.shape[2]
    T3 = T - _RF
    if Cin < 1 or Cout < 1:
        raise ValueError("num_input / num_output must be at least 1")
    if T3 < 1:
        raise ValueError(f"time={T} smaller than the receptive field {_RF + 1}")
    # H % 8 != 0 still works but wastes sublanes/MXU rows; keep H 8-aligned.

    Cin_pad = max(8, -(-Cin // 8) * 8)
    in_bytes = jnp.dtype(input_dtype).itemsize
    out_bytes = jnp.dtype(output_dtype).itemsize
    g = 128 // math.gcd(128, T)

    if batch_tile is None:
        nb = _pick_batch_tile(N, T, lane_budget)
    else:
        nb = max(1, min(int(batch_tile), N))
        if nb < N and (nb * T) % 128 != 0:        # respect the (8,128) tiling rule
            nb = min(-(-nb // g) * g, N)
    # Clamp the block so its working set fits comfortably in v7x's 64 MiB VMEM.
    while nb > g and _vmem_block_estimate(nb * T, Cin_pad, H, Cout,
                                          in_bytes, out_bytes) > _VMEM_BUDGET:
        nb = max(g, ((nb // g) - 1) * g)

    n_blocks = -(-N // nb)
    Npad = n_blocks * nb
    Lb = nb * T
    lane_pad = 0
    if n_blocks == 1:
        # Single block: keep the lane width 128-aligned by padding flat lanes
        # instead of padding whole samples.
        Lb_r = -(-Lb // 128) * 128
        lane_pad = Lb_r - Lb
        Lb = Lb_r
    Ltot = Lb * n_blocks

    x = x_nct
    if Npad != N:
        x = jnp.pad(x, ((0, Npad - N), (0, 0), (0, 0)))      # padded rows discarded
    if Cin_pad != Cin:
        x = jnp.pad(x, ((0, 0), (0, Cin_pad - Cin), (0, 0)))  # zero channels
    # Channels-first, batch*time flattened onto the lane axis (fused with the
    # input-dtype downcast: one cheap XLA pass, halves HBM bytes for bf16).
    x2 = jnp.transpose(x.astype(input_dtype), (1, 0, 2)).reshape(Cin_pad, Npad * T)
    if lane_pad:
        x2 = jnp.pad(x2, ((0, 0), (0, lane_pad)))

    # Tap-major weights (K, Cout_l, Cin_l) in the MXU operand dtype; f32 biases.
    w1k = jnp.transpose(w1, (0, 2, 1))                         # (K1, H, Cin)
    if Cin_pad != Cin:
        w1k = jnp.pad(w1k, ((0, 0), (0, 0), (0, Cin_pad - Cin)))
    w1k = w1k.astype(mxu_dtype)
    w2k = jnp.transpose(w2, (0, 2, 1)).astype(mxu_dtype)       # (K2, H, H)
    w3k = jnp.transpose(w3, (0, 2, 1)).astype(mxu_dtype)       # (K3, Cout, H)
    b1c = jnp.reshape(b1, (H, 1)).astype(jnp.float32)
    b2c = jnp.reshape(b2, (H, 1)).astype(jnp.float32)
    b3c = jnp.reshape(b3, (Cout, 1)).astype(jnp.float32)

    est = _vmem_block_estimate(Lb, Cin_pad, H, Cout, in_bytes, out_bytes)
    vmem_limit = int(min(64 << 20, max(32 << 20, 2 * est)))

    full3 = lambda i: (0, 0, 0)
    full2 = lambda i: (0, 0)
    out_flat = pl.pallas_call(
        functools.partial(_cebra_kernel, normalize=normalize,
                          mxu_dtype=mxu_dtype, approx_gelu=approximate_gelu),
        grid=(n_blocks,),
        in_specs=[
            pl.BlockSpec((Cin_pad, Lb), lambda i: (0, i)),   # activation block
            pl.BlockSpec((K1, H, Cin_pad), full3),           # weights: resident
            pl.BlockSpec((H, 1), full2),
            pl.BlockSpec((K2, H, H), full3),
            pl.BlockSpec((H, 1), full2),
            pl.BlockSpec((K3, Cout, H), full3),
            pl.BlockSpec((Cout, 1), full2),
        ],
        out_specs=pl.BlockSpec((Cout, Lb), lambda i: (0, i)),
        out_shape=jax.ShapeDtypeStruct((Cout, Ltot), output_dtype),
        compiler_params=pltpu.CompilerParams(
            dimension_semantics=("parallel",),               # v7x 2-TC sharding
            vmem_limit_bytes=vmem_limit),
    )(x2, w1k, b1c, w2k, b2c, w3k, b3c)

    # Keep only valid columns (real samples, leading T3 positions) and restore
    # the PyTorch NCT layout; this only touches the small embedding tensor.
    out = out_flat[:, :Npad * T].reshape(Cout, Npad, T)[:, :N, :T3]
    out = jnp.transpose(out, (1, 0, 2))                      # (N, Cout, T3)
    # Squeeze(): drop dim 2 when it is size 1 (like torch .squeeze(2)).
    if out.shape[2] == 1:
        out = out[:, :, 0]
    return out


def cebra_ref(x_nct, params, *, normalize=True):
    """Pure-JAX reference of the same forward pass (for verification)."""
    w1, b1, w2, b2, w3, b3 = params
    x = jnp.transpose(x_nct, (0, 2, 1)).astype(jnp.float32)   # NTC

    def conv(x, w, b):
        K = w.shape[0]
        T_out = x.shape[1] - K + 1
        acc = jnp.zeros((x.shape[0], T_out, w.shape[2]), jnp.float32) + b
        for k in range(K):
            acc = acc + jnp.einsum('ntc,cd->ntd', x[:, k:k + T_out, :], w[k])
        return acc

    h = jax.nn.gelu(conv(x, w1, b1), approximate=False)
    h = jax.nn.gelu(conv(h, w2, b2), approximate=False)
    y = conv(h, w3, b3)
    if normalize:
        y = y / jnp.linalg.norm(y, axis=-1, keepdims=True)
    out = jnp.transpose(y, (0, 2, 1))
    if out.ndim > 2 and out.shape[2] == 1:
        out = out[:, :, 0]
    return out


def init_params(key, num_input, hidden, num_output):
    ks = jax.random.split(key, 6)
    scale = 0.1
    w1 = scale * jax.random.normal(ks[0], (K1, num_input, hidden), jnp.float32)
    b1 = scale * jax.random.normal(ks[1], (1, hidden), jnp.float32)
    w2 = scale * jax.random.normal(ks[2], (K2, hidden, hidden), jnp.float32)
    b2 = scale * jax.random.normal(ks[3], (1, hidden), jnp.float32)
    w3 = scale * jax.random.normal(ks[4], (K3, hidden, num_output), jnp.float32)
    b3 = scale * jax.random.normal(ks[5], (1, num_output), jnp.float32)
    return (w1, b1, w2, b2, w3, b3)


if __name__ == "__main__":
    key = jax.random.PRNGKey(0)
    k_x, k_p = jax.random.split(key)

    N, num_input, time_len = 2, 4, 16          # num_samples x num_input x time
    hidden, num_output = 32, 8
    T3 = time_len - _RF

    x = jax.random.normal(k_x, (N, num_input, time_len), jnp.float32)
    params = init_params(k_p, num_input, hidden, num_output)

    TOL_F32 = 1e-2      # structural check (f32 MXU path)
    TOL_BF16 = 5e-2     # bf16-operand path vs bf16-quantized-input reference

    # 1) full-precision path (f32 DMA + f32 MXU operands) vs pure-JAX reference.
    out32 = jax.block_until_ready(
        cebra_forward(x, params, normalize=True,
                      input_dtype=jnp.float32, mxu_dtype=jnp.float32))
    ref32 = jax.block_until_ready(cebra_ref(x, params, normalize=True))
    assert out32.shape == (N, num_output, T3), out32.shape
    err32 = float(jnp.max(jnp.abs(out32 - ref32)))
    assert err32 < TOL_F32, err32

    # 2) default fast path (bf16 DMA + bf16 MXU operands, f32 accumulation)
    #    vs reference fed the same bf16-quantized input.
    out16 = jax.block_until_ready(cebra_forward(x, params, normalize=True))
    x_q = x.astype(jnp.bfloat16).astype(jnp.float32)
    ref16 = jax.block_until_ready(cebra_ref(x_q, params, normalize=True))
    assert out16.shape == (N, num_output, T3), out16.shape
    err16 = float(jnp.max(jnp.abs(out16 - ref16)))
    assert err16 < TOL_BF16, err16
    # embeddings lie on the unit hypersphere (normalize=True; norm taken in f32)
    norms = jnp.linalg.norm(out16, axis=1)
    assert bool(jnp.all(jnp.abs(norms - 1.0) < 1e-3)), norms

    # 3) multi-block grid + batch padding, explicit batch_tile (f32 check).
    N2 = 20
    x_big = jax.random.normal(jax.random.PRNGKey(1),
                              (N2, num_input, time_len), jnp.float32)
    out_mb = jax.block_until_ready(
        cebra_forward(x_big, params, normalize=True, batch_tile=8,
                      input_dtype=jnp.float32, mxu_dtype=jnp.float32))
    ref_mb = jax.block_until_ready(cebra_ref(x_big, params, normalize=True))
    assert out_mb.shape == (N2, num_output, T3), out_mb.shape
    err_mb = float(jnp.max(jnp.abs(out_mb - ref_mb)))
    assert err_mb < TOL_F32, err_mb

    # 4) auto-picked multi-block path (>=2 blocks for v7x) on the default path.
    N3 = 40
    x_mid = jax.random.normal(jax.random.PRNGKey(2),
                              (N3, num_input, time_len), jnp.float32)
    out_auto = jax.block_until_ready(cebra_forward(x_mid, params, normalize=True))
    ref_auto = jax.block_until_ready(
        cebra_ref(x_mid.astype(jnp.bfloat16).astype(jnp.float32), params))
    assert out_auto.shape == (N3, num_output, T3), out_auto.shape
    err_auto = float(jnp.max(jnp.abs(out_auto - ref_auto)))
    assert err_auto < TOL_BF16, err_auto

    print("KERNEL_OK")
</pallas_src>

<mosaic_0001>
module attributes {stable_mosaic.version = 11 : i64} {
  func.func @_cebra_kernel(%arg0: i32, %arg1: memref<8x128xf32, #tpu.memory_space<vmem>>, %arg2: memref<2x32x8xf32, #tpu.memory_space<vmem>>, %arg3: memref<32x1xf32, #tpu.memory_space<vmem>>, %arg4: memref<3x32x32xf32, #tpu.memory_space<vmem>>, %arg5: memref<32x1xf32, #tpu.memory_space<vmem>>, %arg6: memref<3x8x32xf32, #tpu.memory_space<vmem>>, %arg7: memref<8x1xf32, #tpu.memory_space<vmem>>, %arg8: memref<8x128xf32, #tpu.memory_space<vmem>>) attributes {dimension_semantics = [#tpu.dimension_semantics<parallel>], iteration_bounds = array<i64: 1>, scalar_prefetch = 0 : i64, scratch_operands = 0 : i64, tpu.core_type = #tpu.core_type<tc>, window_params = [{transform_indices = @transform_0, window_bounds = array<i64: 8, 128>}, {pipeline_mode = #tpu.pipeline_mode<synchronous>, transform_indices = @transform_1, window_bounds = array<i64: 2, 32, 8>}, {pipeline_mode = #tpu.pipeline_mode<synchronous>, transform_indices = @transform_2, window_bounds = array<i64: 32, 1>}, {pipeline_mode = #tpu.pipeline_mode<synchronous>, transform_indices = @transform_3, window_bounds = array<i64: 3, 32, 32>}, {pipeline_mode = #tpu.pipeline_mode<synchronous>, transform_indices = @transform_4, window_bounds = array<i64: 32, 1>}, {pipeline_mode = #tpu.pipeline_mode<synchronous>, transform_indices = @transform_5, window_bounds = array<i64: 3, 8, 32>}, {pipeline_mode = #tpu.pipeline_mode<synchronous>, transform_indices = @transform_6, window_bounds = array<i64: 8, 1>}, {transform_indices = @transform_7, window_bounds = array<i64: 8, 128>}]} {
    %c0 = arith.constant 0 : index
    %c0_0 = arith.constant 0 : index
    %0 = vector.load %arg1[%c0, %c0_0] : memref<8x128xf32, #tpu.memory_space<vmem>>, vector<8x128xf32>
    %c0_1 = arith.constant 0 : index
    %c0_2 = arith.constant 0 : index
    %c0_3 = arith.constant 0 : index
    %1 = vector.load %arg2[%c0_1, %c0_2, %c0_3] : memref<2x32x8xf32, #tpu.memory_space<vmem>>, vector<1x32x8xf32>
    %2 = vector.shape_cast %1 : vector<1x32x8xf32> to vector<32x8xf32>
    %cst = arith.constant dense<0.000000e+00> : vector<32x128xf32>
    %3 = tpu.matmul %2, %0, %cst {dimension_numbers = #tpu.dot_dimension_numbers<[1], [0], [0], [1], [0, 0, 1, 1], [], []>} : vector<32x8xf32>, vector<8x128xf32>, vector<32x128xf32> -> vector<32x128xf32>
    %c127_i32 = arith.constant 127 : i32
    %4 = tpu.dynamic_rotate %0 by %c127_i32 dim 1 : vector<8x128xf32>, i32 -> vector<8x128xf32>
    %c1 = arith.constant 1 : index
    %c0_4 = arith.constant 0 : index
    %c0_5 = arith.constant 0 : index
    %5 = vector.load %arg2[%c1, %c0_4, %c0_5] : memref<2x32x8xf32, #tpu.memory_space<vmem>>, vector<1x32x8xf32>
    %6 = vector.shape_cast %5 : vector<1x32x8xf32> to vector<32x8xf32>
    %cst_6 = arith.constant dense<0.000000e+00> : vector<32x128xf32>
    %7 = tpu.matmul %6, %4, %cst_6 {dimension_numbers = #tpu.dot_dimension_numbers<[1], [0], [0], [1], [0, 0, 1, 1], [], []>} : vector<32x8xf32>, vector<8x128xf32>, vector<32x128xf32> -> vector<32x128xf32>
    %8 = arith.addf %3, %7 : vector<32x128xf32>
    %c0_7 = arith.constant 0 : index
    %c0_8 = arith.constant 0 : index
    %9 = vector.load %arg3[%c0_7, %c0_8] : memref<32x1xf32, #tpu.memory_space<vmem>>, vector<32x1xf32>
    %10 = vector.broadcast %9 : vector<32x1xf32> to vector<32x128xf32>
    %11 = arith.addf %8, %10 : vector<32x128xf32>
    %cst_9 = arith.constant 5.000000e-01 : f32
    %12 = vector.broadcast %cst_9 : f32 to vector<32x128xf32>
    %13 = arith.mulf %12, %11 : vector<32x128xf32>
    %cst_10 = arith.constant 0.707106769 : f32
    %14 = vector.broadcast %cst_10 : f32 to vector<32x128xf32>
    %15 = arith.mulf %11, %14 : vector<32x128xf32>
    %16 = math.erf %15 : vector<32x128xf32>
    %cst_11 = arith.constant 1.000000e+00 : f32
    %17 = vector.broadcast %cst_11 : f32 to vector<32x128xf32>
    %18 = arith.addf %17, %16 : vector<32x128xf32>
    %19 = arith.mulf %13, %18 : vector<32x128xf32>
    %c0_12 = arith.constant 0 : index
    %c0_13 = arith.constant 0 : index
    %c0_14 = arith.constant 0 : index
    %20 = vector.load %arg4[%c0_12, %c0_13, %c0_14] : memref<3x32x32xf32, #tpu.memory_space<vmem>>, vector<1x32x32xf32>
    %21 = vector.shape_cast %20 : vector<1x32x32xf32> to vector<32x32xf32>
    %cst_15 = arith.constant dense<0.000000e+00> : vector<32x128xf32>
    %22 = tpu.matmul %21, %19, %cst_15 {dimension_numbers = #tpu.dot_dimension_numbers<[1], [0], [0], [1], [0, 0, 1, 1], [], []>} : vector<32x32xf32>, vector<32x128xf32>, vector<32x128xf32> -> vector<32x128xf32>
    %c127_i32_16 = arith.constant 127 : i32
    %23 = tpu.dynamic_rotate %19 by %c127_i32_16 dim 1 : vector<32x128xf32>, i32 -> vector<32x128xf32>
    %c1_17 = arith.constant 1 : index
    %c0_18 = arith.constant 0 : index
    %c0_19 = arith.constant 0 : index
    %24 = vector.load %arg4[%c1_17, %c0_18, %c0_19] : memref<3x32x32xf32, #tpu.memory_space<vmem>>, vector<1x32x32xf32>
    %25 = vector.shape_cast %24 : vector<1x32x32xf32> to vector<32x32xf32>
    %cst_20 = arith.constant dense<0.000000e+00> : vector<32x128xf32>
    %26 = tpu.matmul %25, %23, %cst_20 {dimension_numbers = #tpu.dot_dimension_numbers<[1], [0], [0], [1], [0, 0, 1, 1], [], []>} : vector<32x32xf32>, vector<32x128xf32>, vector<32x128xf32> -> vector<32x128xf32>
    %27 = arith.addf %22, %26 : vector<32x128xf32>
    %c126_i32 = arith.constant 126 : i32
    %28 = tpu.dynamic_rotate %19 by %c126_i32 dim 1 : vector<32x128xf32>, i32 -> vector<32x128xf32>
    %c2 = arith.constant 2 : index
    %c0_21 = arith.constant 0 : index
    %c0_22 = arith.constant 0 : index
    %29 = vector.load %arg4[%c2, %c0_21, %c0_22] : memref<3x32x32xf32, #tpu.memory_space<vmem>>, vector<1x32x32xf32>
    %30 = vector.shape_cast %29 : vector<1x32x32xf32> to vector<32x32xf32>
    %cst_23 = arith.constant dense<0.000000e+00> : vector<32x128xf32>
    %31 = tpu.matmul %30, %28, %cst_23 {dimension_numbers = #tpu.dot_dimension_numbers<[1], [0], [0], [1], [0, 0, 1, 1], [], []>} : vector<32x32xf32>, vector<32x128xf32>, vector<32x128xf32> -> vector<32x128xf32>
    %32 = arith.addf %27, %31 : vector<32x128xf32>
    %c0_24 = arith.constant 0 : index
    %c0_25 = arith.constant 0 : index
    %33 = vector.load %arg5[%c0_24, %c0_25] : memref<32x1xf32, #tpu.memory_space<vmem>>, vector<32x1xf32>
    %34 = vector.broadcast %33 : vector<32x1xf32> to vector<32x128xf32>
    %35 = arith.addf %32, %34 : vector<32x128xf32>
    %cst_26 = arith.constant 5.000000e-01 : f32
    %36 = vector.broadcast %cst_26 : f32 to vector<32x128xf32>
    %37 = arith.mulf %36, %35 : vector<32x128xf32>
    %cst_27 = arith.constant 0.707106769 : f32
    %38 = vector.broadcast %cst_27 : f32 to vector<32x128xf32>
    %39 = arith.mulf %35, %38 : vector<32x128xf32>
    %40 = math.erf %39 : vector<32x128xf32>
    %cst_28 = arith.constant 1.000000e+00 : f32
    %41 = vector.broadcast %cst_28 : f32 to vector<32x128xf32>
    %42 = arith.addf %41, %40 : vector<32x128xf32>
    %43 = arith.mulf %37, %42 : vector<32x128xf32>
    %c0_29 = arith.constant 0 : index
    %c0_30 = arith.constant 0 : index
    %c0_31 = arith.constant 0 : index
    %44 = vector.load %arg6[%c0_29, %c0_30, %c0_31] : memref<3x8x32xf32, #tpu.memory_space<vmem>>, vector<1x8x32xf32>
    %45 = vector.shape_cast %44 : vector<1x8x32xf32> to vector<8x32xf32>
    %cst_32 = arith.constant dense<0.000000e+00> : vector<8x128xf32>
    %46 = tpu.matmul %45, %43, %cst_32 {dimension_numbers = #tpu.dot_dimension_numbers<[1], [0], [0], [1], [0, 0, 1, 1], [], []>} : vector<8x32xf32>, vector<32x128xf32>, vector<8x128xf32> -> vector<8x128xf32>
    %c127_i32_33 = arith.constant 127 : i32
    %47 = tpu.dynamic_rotate %43 by %c127_i32_33 dim 1 : vector<32x128xf32>, i32 -> vector<32x128xf32>
    %c1_34 = arith.constant 1 : index
    %c0_35 = arith.constant 0 : index
    %c0_36 = arith.constant 0 : index
    %48 = vector.load %arg6[%c1_34, %c0_35, %c0_36] : memref<3x8x32xf32, #tpu.memory_space<vmem>>, vector<1x8x32xf32>
    %49 = vector.shape_cast %48 : vector<1x8x32xf32> to vector<8x32xf32>
    %cst_37 = arith.constant dense<0.000000e+00> : vector<8x128xf32>
    %50 = tpu.matmul %49, %47, %cst_37 {dimension_numbers = #tpu.dot_dimension_numbers<[1], [0], [0], [1], [0, 0, 1, 1], [], []>} : vector<8x32xf32>, vector<32x128xf32>, vector<8x128xf32> -> vector<8x128xf32>
    %51 = arith.addf %46, %50 : vector<8x128xf32>
    %c126_i32_38 = arith.constant 126 : i32
    %52 = tpu.dynamic_rotate %43 by %c126_i32_38 dim 1 : vector<32x128xf32>, i32 -> vector<32x128xf32>
    %c2_39 = arith.constant 2 : index
    %c0_40 = arith.constant 0 : index
    %c0_41 = arith.constant 0 : index
    %53 = vector.load %arg6[%c2_39, %c0_40, %c0_41] : memref<3x8x32xf32, #tpu.memory_space<vmem>>, vector<1x8x32xf32>
    %54 = vector.shape_cast %53 : vector<1x8x32xf32> to vector<8x32xf32>
    %cst_42 = arith.constant dense<0.000000e+00> : vector<8x128xf32>
    %55 = tpu.matmul %54, %52, %cst_42 {dimension_numbers = #tpu.dot_dimension_numbers<[1], [0], [0], [1], [0, 0, 1, 1], [], []>} : vector<8x32xf32>, vector<32x128xf32>, vector<8x128xf32> -> vector<8x128xf32>
    %56 = arith.addf %51, %55 : vector<8x128xf32>
    %c0_43 = arith.constant 0 : index
    %c0_44 = arith.constant 0 : index
    %57 = vector.load %arg7[%c0_43, %c0_44] : memref<8x1xf32, #tpu.memory_space<vmem>>, vector<8x1xf32>
    %58 = vector.broadcast %57 : vector<8x1xf32> to vector<8x128xf32>
    %59 = arith.addf %56, %58 : vector<8x128xf32>
    %60 = arith.mulf %59, %59 : vector<8x128xf32>
    %cst_45 = arith.constant dense<0.000000e+00> : vector<128xf32>
    %61 = vector.multi_reduction <add>, %60, %cst_45 [0] : vector<8x128xf32> to vector<128xf32>
    %62 = vector.shape_cast %61 : vector<128xf32> to vector<1x128xf32>
    %cst_46 = arith.constant 9.99999996E-13 : f32
    %63 = vector.broadcast %cst_46 : f32 to vector<1x128xf32>
    %64 = arith.addf %62, %63 : vector<1x128xf32>
    %65 = math.rsqrt %64 : vector<1x128xf32>
    %66 = vector.broadcast %65 : vector<1x128xf32> to vector<8x128xf32>
    %67 = arith.mulf %59, %66 : vector<8x128xf32>
    %c0_47 = arith.constant 0 : index
    %c0_48 = arith.constant 0 : index
    %68 = vector.load %arg8[%c0_47, %c0_48] : memref<8x128xf32, #tpu.memory_space<vmem>>, vector<8x128xf32>
    tpu.vector_store %arg8[%c0_47, %c0_48], %67 {strides = array<i32>} : memref<8x128xf32, #tpu.memory_space<vmem>>, vector<8x128xf32>,
    return
  }
  func.func @transform_0(%arg0: i32) -> (i32, i32) {
    %c0_i32 = arith.constant 0 : i32
    %c0_i32_0 = arith.constant 0 : i32
    return %c0_i32, %arg0 : i32, i32
  }
  func.func @transform_1(%arg0: i32) -> (i32, i32, i32) {
    %c0_i32 = arith.constant 0 : i32
    %c0_i32_0 = arith.constant 0 : i32
    %c0_i32_1 = arith.constant 0 : i32
    %c0_i32_2 = arith.constant 0 : i32
    return %c0_i32, %c0_i32_0, %c0_i32_1 : i32, i32, i32
  }
  func.func @transform_2(%arg0: i32) -> (i32, i32) {
    %c0_i32 = arith.constant 0 : i32
    %c0_i32_0 = arith.constant 0 : i32
    %c0_i32_1 = arith.constant 0 : i32
    return %c0_i32, %c0_i32_0 : i32, i32
  }
  func.func @transform_3(%arg0: i32) -> (i32, i32, i32) {
    %c0_i32 = arith.constant 0 : i32
    %c0_i32_0 = arith.constant 0 : i32
    %c0_i32_1 = arith.constant 0 : i32
    %c0_i32_2 = arith.constant 0 : i32
    return %c0_i32, %c0_i32_0, %c0_i32_1 : i32, i32, i32
  }
  func.func @transform_4(%arg0: i32) -> (i32, i32) {
    %c0_i32 = arith.constant 0 : i32
    %c0_i32_0 = arith.constant 0 : i32
    %c0_i32_1 = arith.constant 0 : i32
    return %c0_i32, %c0_i32_0 : i32, i32
  }
  func.func @transform_5(%arg0: i32) -> (i32, i32, i32) {
    %c0_i32 = arith.constant 0 : i32
    %c0_i32_0 = arith.constant 0 : i32
    %c0_i32_1 = arith.constant 0 : i32
    %c0_i32_2 = arith.constant 0 : i32
    return %c0_i32, %c0_i32_0, %c0_i32_1 : i32, i32, i32
  }
  func.func @transform_6(%arg0: i32) -> (i32, i32) {
    %c0_i32 = arith.constant 0 : i32
    %c0_i32_0 = arith.constant 0 : i32
    %c0_i32_1 = arith.constant 0 : i32
    return %c0_i32, %c0_i32_0 : i32, i32
  }
  func.func @transform_7(%arg0: i32) -> (i32, i32) {
    %c0_i32 = arith.constant 0 : i32
    %c0_i32_0 = arith.constant 0 : i32
    return %c0_i32, %arg0 : i32, i32
  }
}

</mosaic_0001>

<bundles_post_ra>
// kernel: tpu_custom_call.1
= control target key start
LH: loop header
LB: loop body
LE: loop exit
PB: predicated region body
PF: predicated region fallthrough
CT: control target
= control target key end

     0   :  { %vm39_vm0 = vcmask 64512   ;;  %s1251_s28 = smov 127   ;;  %v1252_v2 = vmov 0   ;;  %s1444_s0 = inlined_call_operand.vmem [shape: f32[8,128], index: 0, kind: input, shape index: {}]   ;;  %s1445_s1 = inlined_call_operand.vmem [shape: f32[2,32,8], index: 1, kind: input, shape index: {}]   ;;  %s1446_s2 = inlined_call_operand.vmem [shape: f32[32,1], index: 2, kind: input, shape index: {}]   ;;  %s1447_s3 = inlined_call_operand.vmem [shape: f32[3,32,32], index: 3, kind: input, shape index: {}]   ;;  %s1448_s4 = inlined_call_operand.vmem [shape: f32[32,1], index: 4, kind: input, shape index: {}]   ;;  %s1449_s5 = inlined_call_operand.vmem [shape: f32[3,8,32], index: 5, kind: input, shape index: {}]   ;;  %s1450_s6 = inlined_call_operand.vmem [shape: f32[8,1], index: 6, kind: input, shape index: {}]   ;;  %s1451_s7 = inlined_call_operand.hbm [shape: f32[8,128], index: 7, kind: output, shape index: {}]  }
   0x1   :  { %v27_v0 = vld [vmem:[%s1444_s0] sm:$0xff]  ;;  %1168 = vset.pattern.permute.xlu1 %v1252_v2  ;;  %v235_v3 = vld [vmem:[%s1446_s2 + $0x8] sm:$0xff]  ;;  %1167 = vset.pattern.permute.xlu0 %v1252_v2 }
   0x2   :  { %v929_v1 = vld [vmem:[%s1445_s1 + $0x20] sm:$0xff]  ;;  %32 = vrot.lane.b32.xlu0 %v27_v0, %s1251_s28  ;;  %245 = vperm.xlu1 %1168, %v235_v3  }
   0x3   :  { %1017 = vmatprep.mubr.msk.f32.mxu0 %vm39_vm0, %v929_v1  ;;  %v234_v4 = vld [vmem:[%s1446_s2] sm:$0xff] }
   0x4   :  { %12 = vsyncpa [#allocation3], 0  ;;  %v236_v5 = vld [vmem:[%s1446_s2 + $0x10] sm:$0xff]  ;;  %v237_v6 = vld [vmem:[%s1446_s2 + $0x18] sm:$0xff]  ;;  %vm299_vm1 = vcmask 261120   ;;  %s1253_s27 = smov 126  }
   0x5   :  { %v930_v8 = vld [vmem:[%s1445_s1 + $0x28] sm:$0xff]  ;;  %v931_v9 = vld [vmem:[%s1445_s1 + $0x30] sm:$0xff]  ;;  %v932_v10 = vld [vmem:[%s1445_s1 + $0x38] sm:$0xff]  ;;  %vm1255_vm2 = vmmov 0  }
   0x6   :  { %240 = vperm.xlu0 %1167, %v234_v4   ;;  %250 = vperm.xlu1 %1168, %v236_v5   ;;  %v28_v11 = vld [vmem:[%s1445_s1] sm:$0xff]  ;;  %v29_v12 = vld [vmem:[%s1445_s1 + $0x8] sm:$0xff]  ;;  %v30_v13 = vld [vmem:[%s1445_s1 + $0x10] sm:$0xff] }
   0x7   :  { %v31_v14 = vld [vmem:[%s1445_s1 + $0x18] sm:$0xff]  ;;  %v941_v44 = vld [vmem:[%s1447_s3 + $0x20] sm:$0xff]  ;;  %v609_v53 = vld [vmem:[%s1448_s4 + $0x8] sm:$0xff] }
   0x8   :  { %1039 = vmatprep.mubr.msk.f32.mxu1 %vm299_vm1, %v941_v44  ;;  %v608_v52 = vld [vmem:[%s1448_s4] sm:$0xff]  ;;  %v610_v54 = vld [vmem:[%s1448_s4 + $0x10] sm:$0xff]  ;;  %v611_v55 = vld [vmem:[%s1448_s4 + $0x18] sm:$0xff] }
   0x9   :  { %v942_v1 = vld [vmem:[%s1447_s3 + $0x28] sm:$0xff]  ;;  %v943_v2 = vld [vmem:[%s1447_s3 + $0x30] sm:$0xff] }
   0xa   :  { %255 = vperm.xlu1 %1168, %v237_v6   ;;  %v944_v6 = vld [vmem:[%s1447_s3 + $0x38] sm:$0xff] }
  0x74   :  { %v33_v7 = vpop.permute.xlu0 %32 }
  0x75   :  { %1015 = vmatprep.subr.mxu0 %v33_v7 }
  0x76   :  { %1016 = vmatpush3.msra.mxu0 %v33_v7  ;;  %v282_v7 = vld [vmem:[%s1447_s3] sm:$0xff] }
  0x77   :  { %1018 = vmatmul.mubr.msk.f32.vlgmr.msra.gmra.mrb[0].mxu0 %vm39_vm0, %v930_v8  ;;  %1023 = vmatprep.subr.mxu0 %v27_v0 }
  0x78   :  { %1024 = vmatpush3.msra.mxu0 %v27_v0  ;;  %1020 = vmatprep.mubr.msk.f32.mxu0 %vm39_vm0, %v931_v9 }
  0x7b   :  { %1021 = vmatmul.mubr.msk.f32.gmra.mrb[2].mxu0 %vm39_vm0, %v932_v10 }
  0x7c   :  { %1025 = vmatprep.mubr.msk.f32.mxu0 %vm39_vm0, %v28_v11  ;;  %v283_v11 = vld [vmem:[%s1447_s3 + $0x8] sm:$0xff] }
  0x7f   :  { %1026 = vmatmul.mubr.msk.f32.vlgmr.msra.gmra.mrb[0].mxu0 %vm39_vm0, %v29_v12  ;;  %v284_v12 = vld [vmem:[%s1447_s3 + $0x10] sm:$0xff] }
  0x80   :  { %1028 = vmatprep.mubr.msk.f32.mxu0 %vm39_vm0, %v30_v13 }
  0x81   :  { %v246_v15 = vpop.permute.xlu1 %245 }
  0x83   :  { %1029 = vmatmul.mubr.msk.f32.gmra.mrb[2].mxu0 %vm39_vm0, %v31_v14  ;;  %v285_v14 = vld [vmem:[%s1447_s3 + $0x18] sm:$0xff] }
  0x85   :  { %v251_v16 = vpop.permute.xlu1 %250  ;;  %v241_v17 = vpop.permute.xlu0 %240 }
  0x89   :  { %v256_v23 = vpop.permute.xlu1 %255 }
 0x152   :  { %v1027_v18 = vpop.f32.mrb[0].mxu0 }
 0x153   :  { %v259_v19 = vadd.f32 %v1027_v18, %v246_v15  ;;  %v215_v20 = vpop.f32.mrb[1].mxu0  ;;  %v953_v15 = vld [vmem:[%s1447_s3 + $0x40] sm:$0xff]  ;;  %v956_v18 = vld [vmem:[%s1447_s3 + $0x58] sm:$0xff] }
 0x154   :  { %v258_v21 = vadd.f32 %v241_v17, %v215_v20  ;;  %v955_v17 = vld [vmem:[%s1447_s3 + $0x50] sm:$0xff] }
 0x155   :  { %v267_v22 = vmul.f32 0.70710677, %v259_v19  ;;  %v263_v33 = vmul.f32 0.5, %v259_v19 }
 0x156   :  { %v266_v24 = vmul.f32 0.70710677, %v258_v21  ;;  %v1030_v25 = vpop.f32.mrb[2].mxu0  ;;  %v262_v35 = vmul.f32 0.5, %v258_v21 }
 0x157   :  { %1209 = verf.f32 %v267_v22  ;;  %v261_v26 = vadd.f32 %v1030_v25, %v256_v23  ;;  %v225_v27 = vpop.f32.mrb[3].mxu0 }
 0x158   :  { %1211 = verf.f32 %v266_v24  ;;  %v260_v28 = vadd.f32 %v251_v16, %v225_v27  ;;  %v954_v16 = vld [vmem:[%s1447_s3 + $0x48] sm:$0xff] }
 0x159   :  { %v269_v29 = vmul.f32 0.70710677, %v261_v26  ;;  %v265_v41 = vmul.f32 0.5, %v261_v26 }
 0x15a   :  { %v268_v30 = vmul.f32 0.70710677, %v260_v28  ;;  %v264_v43 = vmul.f32 0.5, %v260_v28 }
 0x15b   :  { %1213 = verf.f32 %v269_v29 }
 0x15c   :  { %1215 = verf.f32 %v268_v30 }
 0x161   :  { %v1210_v31 = vpop.eup %1209 }
 0x162   :  { %v1212_v32 = vpop.eup %1211  ;;  %v275_v34 = vadd.f32 1.0, %v1210_v31 }
 0x163   :  { %v274_v36 = vadd.f32 1.0, %v1212_v32 }
 0x164   :  { %v279_v37 = vmul.f32 %v275_v34, %v263_v33 }
 0x165   :  { %v1214_v38 = vpop.eup %1213  ;;  %v278_v39 = vmul.f32 %v274_v36, %v262_v35  ;;  %v1254_v35 = vmov 0.0|0.0  }
 0x166   :  { %v1216_v40 = vpop.eup %1215  ;;  %v277_v42 = vadd.f32 1.0, %v1214_v38  ;;  %1130 = vmatprep.subr.bf16.mxu0 %v1254_v35 }
 0x167   :  { %v276_v45 = vadd.f32 1.0, %v1216_v40  ;;  %v1169_v46 = vpack.i.bf16 %v279_v37, %v278_v39  ;;  %v1114_v47 = vpack.c.bf16 %v279_v37, %v278_v39 }
 0x168   :  { %v281_v48 = vmul.f32 %v277_v42, %v265_v41 }
 0x169   :  { %v280_v49 = vmul.f32 %v276_v45, %v264_v43  ;;  %1170 = vrot.lane.b32.xlu0 %v1169_v46, %s1251_s28 }
 0x16b   :  { %v1174_v50 = vpack.i.bf16 %v281_v48, %v280_v49  ;;  %v1118_v51 = vpack.c.bf16 %v281_v48, %v280_v49  ;;  %v1256_v49 = vmov 0.0  }
 0x16c   :  { %1081 = vmatprep.mubr.msk.f32.mxu0 %vm1255_vm2, %v1256_v49 }
 0x16d   :  { %1175 = vrot.lane.b32.xlu1 %v1174_v50, %s1251_s28  ;;  %1180 = vrot.lane.b32.xlu0 %v1169_v46, %s1253_s27 }
 0x171   :  { %1185 = vrot.lane.b32.xlu1 %v1174_v50, %s1253_s27  ;;  %614 = vperm.xlu0 %1167, %v608_v52  }
 0x175   :  { %619 = vperm.xlu1 %1168, %v609_v53   ;;  %624 = vperm.xlu0 %1167, %v610_v54  }
 0x179   :  { %629 = vperm.xlu1 %1168, %v611_v55  }
 0x1db   :  { %v1171_v56 = vpop.permute.xlu0 %1170 }
 0x1dc   :  { %v1173_v57 = vunpack.i.h.bf16 %v1171_v56  ;;  %v1172_v58 = vunpack.i.l.bf16 %v1171_v56 }
 0x1de   :  { %v1106_v59 = vpack.c.bf16 %v1173_v57, %v1172_v58  ;;  %v897_v57 = vld [vmem:[%s1450_s6] sm:$0xff] }
 0x1df   :  { %v1176_v60 = vpop.permute.xlu1 %1175  ;;  %v1181_v0 = vpop.permute.xlu0 %1180 }
 0x1e0   :  { %v1178_v61 = vunpack.i.h.bf16 %v1176_v60  ;;  %v1177_v62 = vunpack.i.l.bf16 %v1176_v60  ;;  %1107 = vmatprep.subr.bf16.mxu1 %v1106_v59  ;;  %v1183_v3 = vunpack.i.h.bf16 %v1181_v0  ;;  %v1182_v4 = vunpack.i.l.bf16 %v1181_v0 }
 0x1e1   :  { %1109 = vmatpush3.bf16.msra.mxu1 %v1106_v59 }
 0x1e2   :  { %v1110_v63 = vpack.c.bf16 %v1178_v61, %v1177_v62  ;;  %v1122_v8 = vpack.c.bf16 %v1183_v3, %v1182_v4 }
 0x1e3   :  { %v1186_v5 = vpop.permute.xlu1 %1185 }
 0x1e4   :  { %1111 = vmatprep.subr.bf16.mxu1 %v1110_v63  ;;  %v1188_v9 = vunpack.i.h.bf16 %v1186_v5  ;;  %v1187_v10 = vunpack.i.l.bf16 %v1186_v5 }
 0x1e5   :  { %1113 = vmatpush3.bf16.msra.mxu1 %v1110_v63 }
 0x1e6   :  { %1115 = vmatprep.subr.bf16.mxu1 %v1114_v47  ;;  %v1126_v13 = vpack.c.bf16 %v1188_v9, %v1187_v10  ;;  %v961_v9 = vld [vmem:[%s1449_s5 + $0x8] sm:$0xff] }
 0x1e8   :  { %1040 = vmatmul.mubr.msk.f32.vlgmr.msra.gmra.mrb[0].mxu1 %vm299_vm1, %v942_v1 }
 0x1e9   :  { %1117 = vmatpush3.bf16.msra.mxu1 %v1114_v47  ;;  %1042 = vmatprep.mubr.msk.f32.mxu1 %vm299_vm1, %v943_v2 }
 0x1ea   :  { %1119 = vmatprep.subr.bf16.mxu1 %v1118_v51 }
 0x1ec   :  { %1043 = vmatmul.mubr.msk.f32.gmra.mrb[2].mxu1 %vm299_vm1, %v944_v6 }
 0x1ed   :  { %1121 = vmatpush3.bf16.msra.mxu1 %v1118_v51  ;;  %1053 = vmatprep.mubr.msk.f32.mxu1 %vm299_vm1, %v282_v7 }
 0x1ee   :  { %1123 = vmatprep.subr.bf16.mxu1 %v1122_v8 }
 0x1f0   :  { %1054 = vmatmul.mubr.msk.f32.vlgmr.msra.gmra.mrb[0].mxu1 %vm299_vm1, %v283_v11  ;;  %v615_v20 = vpop.permute.xlu0 %614  ;;  %v964_v11 = vld [vmem:[%s1449_s5 + $0x10] sm:$0xff] }
 0x1f1   :  { %1125 = vmatpush3.bf16.msra.mxu1 %v1122_v8  ;;  %1056 = vmatprep.mubr.msk.f32.mxu1 %vm299_vm1, %v284_v12  ;;  %v656_v12 = vld [vmem:[%s1449_s5] sm:$0xff]  ;;  %s1257_s5 = smov [#allocation2]  }
 0x1f2   :  { %1127 = vmatprep.subr.bf16.mxu1 %v1126_v13  ;;  %s921_s14 = sshll.u32 %s1257_s5, 4  ;;  %s922_s14 = int_to_ptr.vmem [resolvable:$true] %s921_s14 }
 0x1f3   :  { %s1227_s4 = scalar_lea.vmem %s922_s14, 128  ;;  %p1232_p1 = scmp.lt.s32.totalorder %s922_s14, %s922_s14 }
 0x1f4   :  { %1057 = vmatmul.mubr.msk.f32.gmra.mrb[2].mxu1 %vm299_vm1, %v285_v14  ;;  %v620_v19 = vpop.permute.xlu1 %619  ;;  %v625_v29 = vpop.permute.xlu0 %624  ;;  %p1228_p0 = scmp.ne.s32.totalorder %s922_s14, %s1227_s4  ;;  %p1233_p2 = scmp.lt.s32.totalorder %s1227_s4, %s1227_s4 }
 0x1f5   :  { %1129 = vmatpush3.bf16.msra.mxu1 %v1126_v13  ;;  %1067 = vmatprep.mubr.msk.f32.mxu1 %vm299_vm1, %v953_v15 }
 0x1f6   :  { %1142 = vmatprep.subr.bf16.mxu1 %v1254_v35  ;;  %p1234_p3 = por %p1233_p2, %p1232_p1 }
 0x1f8   :  { %1068 = vmatmul.mubr.msk.f32.vlgmr.msra.gmra.mrb[0].mxu1 %vm299_vm1, %v954_v16  ;;  %v630_v26 = vpop.permute.xlu1 %629  ;;  %p1235_p4 = pnand %p1234_p3, %p1228_p0 }
 0x1f9   :  { %1070 = vmatprep.mubr.msk.f32.mxu1 %vm299_vm1, %v955_v17 }
 0x1fc   :  { %1071 = vmatmul.mubr.msk.f32.gmra.mrb[2].mxu1 %vm299_vm1, %v956_v18 }
 0x1fd   :  { %1103 = vmatprep.mubr.msk.f32.mxu1 %vm1255_vm2, %v1256_v49 }
 0x2cb   :  { %v1069_v21 = vpop.f32.mrb[0].mxu1 }
 0x2cc   :  { %v633_v22 = vadd.f32 %v1069_v21, %v620_v19  ;;  %v585_v23 = vpop.f32.mrb[1].mxu1 }
 0x2cd   :  { %v632_v24 = vadd.f32 %v615_v20, %v585_v23 }
 0x2ce   :  { %v641_v25 = vmul.f32 0.70710677, %v633_v22  ;;  %v637_v38 = vmul.f32 0.5, %v633_v22 }
 0x2cf   :  { %v640_v27 = vmul.f32 0.70710677, %v632_v24  ;;  %v1072_v28 = vpop.f32.mrb[2].mxu1  ;;  %v636_v40 = vmul.f32 0.5, %v632_v24 }
 0x2d0   :  { %1217 = verf.f32 %v641_v25  ;;  %v635_v30 = vadd.f32 %v1072_v28, %v630_v26  ;;  %v595_v31 = vpop.f32.mrb[3].mxu1 }
 0x2d1   :  { %1219 = verf.f32 %v640_v27  ;;  %v634_v32 = vadd.f32 %v625_v29, %v595_v31 }
 0x2d2   :  { %v643_v33 = vmul.f32 0.70710677, %v635_v30  ;;  %v639_v46 = vmul.f32 0.5, %v635_v30 }
 0x2d3   :  { %v642_v34 = vmul.f32 0.70710677, %v634_v32  ;;  %v638_v48 = vmul.f32 0.5, %v634_v32 }
 0x2d4   :  { %1221 = verf.f32 %v643_v33 }
 0x2d5   :  { %1223 = verf.f32 %v642_v34 }
 0x2da   :  { %v1218_v36 = vpop.eup %1217 }
 0x2db   :  { %v1220_v37 = vpop.eup %1219  ;;  %v649_v39 = vadd.f32 1.0, %v1218_v36 }
 0x2dc   :  { %v648_v41 = vadd.f32 1.0, %v1220_v37 }
 0x2dd   :  { %v653_v42 = vmul.f32 %v649_v39, %v637_v38 }
 0x2de   :  { %v1222_v43 = vpop.eup %1221  ;;  %v652_v44 = vmul.f32 %v648_v41, %v636_v40 }
 0x2df   :  { %v1224_v45 = vpop.eup %1223  ;;  %v651_v47 = vadd.f32 1.0, %v1222_v43 }
 0x2e0   :  { %v650_v50 = vadd.f32 1.0, %v1224_v45  ;;  %v1189_v51 = vpack.i.bf16 %v653_v42, %v652_v44  ;;  %v1137_v52 = vpack.c.bf16 %v653_v42, %v652_v44 }
 0x2e1   :  { %v655_v53 = vmul.f32 %v651_v47, %v639_v46 }
 0x2e2   :  { %v654_v54 = vmul.f32 %v650_v50, %v638_v48  ;;  %1190 = vrot.lane.b32.xlu0 %v1189_v51, %s1251_s28 }
 0x2e4   :  { %v1194_v55 = vpack.i.bf16 %v655_v53, %v654_v54  ;;  %v1140_v56 = vpack.c.bf16 %v655_v53, %v654_v54 }
 0x2e6   :  { %1200 = vrot.lane.b32.xlu0 %v1189_v51, %s1253_s27  ;;  %1195 = vrot.lane.b32.xlu1 %v1194_v55, %s1251_s28 }
 0x2ea   :  { %900 = vperm.xlu0 %1167, %v897_v57   ;;  %1205 = vrot.lane.b32.xlu1 %v1194_v55, %s1253_s27 }
 0x354   :  { %v1191_v58 = vpop.permute.xlu0 %1190 }
 0x355   :  { %v1193_v59 = vunpack.i.h.bf16 %v1191_v58  ;;  %v1192_v60 = vunpack.i.l.bf16 %v1191_v58 }
 0x357   :  { %v1131_v61 = vpack.c.bf16 %v1193_v59, %v1192_v60 }
 0x358   :  { %v1201_v62 = vpop.permute.xlu0 %1200  ;;  %v1196_v63 = vpop.permute.xlu1 %1195 }
 0x359   :  { %v1203_v0 = vunpack.i.h.bf16 %v1201_v62  ;;  %v1202_v1 = vunpack.i.l.bf16 %v1201_v62  ;;  %v1198_v2 = vunpack.i.h.bf16 %v1196_v63  ;;  %v1197_v3 = vunpack.i.l.bf16 %v1196_v63  ;;  %1132 = vmatpush3.bf16.msra.mxu0 %v1131_v61 }
 0x35a   :  { %1133 = vmatprep.subr.bf16.mxu0 %v1254_v35 }
 0x35b   :  { %v1143_v4 = vpack.c.bf16 %v1203_v0, %v1202_v1  ;;  %v1134_v5 = vpack.c.bf16 %v1198_v2, %v1197_v3 }
 0x35c   :  { %v1206_v6 = vpop.permute.xlu1 %1205 }
 0x35d   :  { %v1208_v7 = vunpack.i.h.bf16 %v1206_v6  ;;  %v1207_v8 = vunpack.i.l.bf16 %v1206_v6  ;;  %1135 = vmatpush3.bf16.msra.mxu0 %v1134_v5  ;;  %1144 = vmatpush3.bf16.msra.mxu1 %v1143_v4 }
 0x35e   :  { %1136 = vmatprep.subr.bf16.mxu0 %v1254_v35  ;;  %1145 = vmatprep.subr.bf16.mxu1 %v1254_v35 }
 0x35f   :  { %v1146_v10 = vpack.c.bf16 %v1208_v7, %v1207_v8 }
 0x360   :  { %1082 = vmatmul.mubr.msk.f32.vlgmr.msra.gmra.mrb[4].mxu0 %vm299_vm1, %v961_v9 }
 0x361   :  { %1138 = vmatpush3.bf16.msra.mxu0 %v1137_v52  ;;  %1147 = vmatpush3.bf16.msra.mxu1 %v1146_v10 }
 0x362   :  { %1139 = vmatprep.subr.bf16.mxu0 %v1254_v35  ;;  %1092 = vmatprep.mubr.msk.f32.mxu0 %vm1255_vm2, %v1256_v49 }
 0x364   :  { %1104 = vmatmul.mubr.msk.f32.vlgmr.msra.gmra.mrb[4].mxu1 %vm299_vm1, %v964_v11 }
 0x365   :  { %1141 = vmatpush3.bf16.msra.mxu0 %v1140_v56 }
 0x368   :  { %1093 = vmatmul.mubr.msk.f32.vlgmr.msra.gmra.mrb[6].mxu0 %vm299_vm1, %v656_v12 }
 0x369   :  { %v901_v21 = vpop.permute.xlu0 %900 }
 0x433   :  { %v736_v13 = vpop.f32.mrb[4].mxu0 }
 0x434   :  { %v1083_v14 = vpop.f32.mrb[5].mxu0 }
 0x437   :  { %v892_v15 = vpop.f32.mrb[4].mxu1 }
 0x438   :  { %v1105_v16 = vpop.f32.mrb[5].mxu1 }
 0x43b   :  { %v809_v17 = vpop.f32.mrb[6].mxu0 }
 0x43c   :  { %v810_v18 = vadd.f32 %v809_v17, %v736_v13  ;;  %v1094_v19 = vpop.f32.mrb[7].mxu0 }
 0x43e   :  { %v896_v20 = vadd.f32 %v892_v15, %v810_v18 }
 0x440   :  { %v903_v22 = vadd.f32 %v901_v21, %v896_v20 }
 0x442   :  { %v904_v23 = vmul.f32 %v903_v22, %v903_v22 }
 0x444   :  { %v905_v24 = vrot.slane %v904_v23, 4 }
 0x446   :  { %v906_v25 = vadd.f32 %v905_v24, %v904_v23 }
 0x448   :  { %v907_v26 = vrot.slane %v906_v25, 2 }
 0x44a   :  { %v908_v27 = vadd.f32 %v907_v26, %v906_v25 }
 0x44c   :  { %v909_v28 = vrot.slane %v908_v27, 1 }
 0x44e   :  { %v910_v29 = vadd.f32 %v909_v28, %v908_v27 }
 0x450   :  { %v911_v30 = vadd.f32 1e-12, %v910_v29 }
 0x452   :  { %1225 = vrsqrt.f32 %v911_v30 }
 0x45c   :  { %v1226_v31 = vpop.eup %1225 }
 0x45d   :  { %v913_v32 = vmul.f32 %v1226_v31, %v903_v22 }
 0x45f   :  { %914 = vst [vmem:[#allocation2] sm:$0xff] %v913_v32 }
 0x460   :  { %1238 = shalt.err (!%p1235_p4)
}
 0x461   :  { %s1239_s17 = scalar_lea.hbm %s1451_s7, 128 }
 0x462   :  { %p1240_p5 = scmp.ne.s32.totalorder %s1451_s7, %s1239_s17  ;;  %p1243_p6 = scmp.lt.u32.totalorder %s1239_s17, %s1451_s7 }
 0x464   :  { %p1245_p7 = pnand %p1243_p6, %p1240_p5 }
 0x466   :  { %1248 = shalt.err (!%p1245_p7)
}
 0x467   :  { %924 = dma.vmem_to_hbm [thread:$0]  %s922_s14, 128, %s1451_s7, [#allocation3]  }
 0x468   :  { %1249 = dma.done.wait [#allocation3], 128  }
 0x469   :  { %1250 = vsyncadd [#allocation3], 4294967168 }
 0x46a   :  { %928 = vsyncpa [#allocation3], 1 }

</bundles_post_ra>
